<compile_context>
chip_gen: v5e
topology: v5e:2x2
jax: 0.10.0
libtpu: 0.0.40
codegen_flags: <defaults>
</compile_context>

<pallas_src>
import jax
import jax.numpy as jnp
from jax.experimental import pallas as pl
from jax.experimental.pallas import tpu as pltpu


def _filter_layer_kernel(x_ref, w1_ref, b1_ref, w2_ref, b2_ref, out_ref, acc_ref):
    # x_ref:  (b_tile, C, hw_tile)  float32   (HW on lanes, C on sublanes)
    # w1_ref: (C, H1)               float32   (mean 1/HW already folded in)
    # b1_ref: (1, H1)               float32
    # w2_ref: (H1, O)               float32
    # b2_ref: (1, O)                float32
    # out_ref:(b_tile, O)           float32
    # acc_ref:(b_tile, C)           float32 scratch (pooled running sum)
    k = pl.program_id(1)

    @pl.when(k == 0)
    def _():
        acc_ref[...] = jnp.zeros_like(acc_ref)

    # Running pooled SUM over the spatial (lane) axis; f32 accumulation.
    acc_ref[...] += jnp.sum(x_ref[...], axis=-1)

    @pl.when(k == pl.num_programs(1) - 1)
    def _():
        pooled = acc_ref[...]                                   # (b_tile, C)
        # Tiny (M=b_tile, K=C, N=hidden) matmuls: MXU-latency, not throughput,
        # bound -- negligible next to the x read; deliberately left as-is.
        h = jnp.dot(pooled, w1_ref[...],
                    preferred_element_type=jnp.float32) + b1_ref[...]
        h = jnp.maximum(h, 0.0)
        o = jnp.dot(h, w2_ref[...],
                    preferred_element_type=jnp.float32) + b2_ref[...]
        out_ref[...] = jax.nn.sigmoid(o)


def filter_layer(x, w1, b1, w2, b2, *, hw_tile=None,
                 tile_budget_bytes=8 * 1024 * 1024):
    """x: (B, C, H, W) NCHW f32. w1: (C, hidden), b1: (hidden,), w2: (hidden, O), b2: (O,).
    Returns sigmoid(fc2(relu(fc1(avg_pool(x))))) with shape (B, O, 1, 1)."""
    B, C, H, W = x.shape
    hidden = w1.shape[1]
    out_planes = w2.shape[1]
    HW = H * W

    # Native layout, free reshape: (B, C, HW) with HW on the lane axis.
    x_flat = x.astype(jnp.float32).reshape(B, C, HW)

    # --- batch tiling: keep blocks sublane-aligned, batch axis multi-block when large.
    if B > 8:
        B_pad = ((B + 7) // 8) * 8
        if B_pad != B:
            x_flat = jnp.pad(x_flat, ((0, B_pad - B), (0, 0), (0, 0)))
        b_tile = 8
    else:
        B_pad = B
        b_tile = B
    grid_b = B_pad // b_tile

    # --- spatial (reduction) tiling: multiple of 128 lanes OR the full extent,
    #     capped at ~tile_budget_bytes of f32 per tile (double-buffered by Pallas).
    LANE = 128
    row_bytes = b_tile * C * 4
    if hw_tile is None:
        if HW * row_bytes <= tile_budget_bytes:
            hw_tile = HW                       # single full-extent tile, no padding
        else:
            hw_tile = max(LANE, (tile_budget_bytes // row_bytes) // LANE * LANE)
    else:
        hw_tile = HW if hw_tile >= HW else max(LANE, (hw_tile // LANE) * LANE)

    hw_padded = pl.cdiv(HW, hw_tile) * hw_tile
    if hw_padded != HW:
        # Zero padding is exact: the 1/HW mean lives in w1, zeros add nothing.
        x_flat = jnp.pad(x_flat, ((0, 0), (0, 0), (0, hw_padded - HW)))
    grid_k = hw_padded // hw_tile

    # Fold the 1/(H*W) mean into fc1's weight; keep all FC math in f32.
    w1_scaled = w1.astype(jnp.float32) * (1.0 / float(HW))
    b1_2d = b1.reshape(1, hidden).astype(jnp.float32)
    w2_f32 = w2.astype(jnp.float32)
    b2_2d = b2.reshape(1, out_planes).astype(jnp.float32)

    # VMEM budget: 2x double-buffered x tile + tiny params/scratch + headroom.
    tile_bytes = b_tile * C * hw_tile * 4
    vmem_limit = int(min(48 * 1024 * 1024,
                         max(32 * 1024 * 1024, 2 * tile_bytes + 8 * 1024 * 1024)))

    param_bytes = (C * hidden + hidden + hidden * out_planes + out_planes) * 4
    cost = pl.CostEstimate(
        flops=int(B_pad * hw_padded * C + 2 * B_pad * C * hidden
                  + 2 * B_pad * hidden * out_planes),
        transcendentals=int(B_pad * out_planes),
        bytes_accessed=int(B_pad * C * hw_padded * 4 + param_bytes
                           + B_pad * out_planes * 4),
    )

    out = pl.pallas_call(
        _filter_layer_kernel,
        out_shape=jax.ShapeDtypeStruct((B_pad, out_planes), jnp.float32),
        grid=(grid_b, grid_k),
        in_specs=[
            pl.BlockSpec((b_tile, C, hw_tile), lambda b, k: (b, 0, k)),
            pl.BlockSpec((C, hidden), lambda b, k: (0, 0)),
            pl.BlockSpec((1, hidden), lambda b, k: (0, 0)),
            pl.BlockSpec((hidden, out_planes), lambda b, k: (0, 0)),
            pl.BlockSpec((1, out_planes), lambda b, k: (0, 0)),
        ],
        out_specs=pl.BlockSpec((b_tile, out_planes), lambda b, k: (b, 0)),
        scratch_shapes=[pltpu.VMEM((b_tile, C), jnp.float32)],
        compiler_params=pltpu.CompilerParams(
            dimension_semantics=("parallel", "arbitrary"),
            vmem_limit_bytes=vmem_limit,
        ),
        cost_estimate=cost,
    )(x_flat, w1_scaled, b1_2d, w2_f32, b2_2d)

    if B_pad != B:
        out = out[:B]
    return out.reshape(B, out_planes, 1, 1)


def _reference_f32(x, w1, b1, w2, b2):
    pooled = jnp.mean(x.astype(jnp.float32), axis=(2, 3))
    h = jnp.maximum(pooled @ w1 + b1, 0.0)
    o = jax.nn.sigmoid(h @ w2 + b2)
    return o.reshape(x.shape[0], w2.shape[1], 1, 1)


if __name__ == "__main__":
    # FilterLayer(in_planes=32, out_planes=32, reduction=16) -> hidden = 2
    in_planes = 32
    out_planes = 32
    reduction = 16
    hidden = out_planes // reduction

    B, H, W = 2, 16, 16

    key = jax.random.PRNGKey(0)
    kx, kx2, k1, k2, k3, k4 = jax.random.split(key, 6)

    x = jax.random.normal(kx, (B, in_planes, H, W), dtype=jnp.float32)

    # Deterministic parameter init (PyTorch Linear-style uniform bounds).
    bound1 = 1.0 / jnp.sqrt(in_planes)
    w1 = jax.random.uniform(k1, (in_planes, hidden), minval=-bound1, maxval=bound1,
                            dtype=jnp.float32)
    b1 = jax.random.uniform(k2, (hidden,), minval=-bound1, maxval=bound1,
                            dtype=jnp.float32)
    bound2 = 1.0 / jnp.sqrt(hidden)
    w2 = jax.random.uniform(k3, (hidden, out_planes), minval=-bound2, maxval=bound2,
                            dtype=jnp.float32)
    b2 = jax.random.uniform(k4, (out_planes,), minval=-bound2, maxval=bound2,
                            dtype=jnp.float32)

    # 1) Multi-step reduction path: hw_tile=128 forces grid_k=2 over HW=256
    #    (exercises the accumulator init/accumulate/finalize pipeline).
    y = filter_layer(x, w1, b1, w2, b2, hw_tile=128)
    y = jax.block_until_ready(y)
    assert y.shape == (B, out_planes, 1, 1), y.shape
    y_ref = _reference_f32(x, w1, b1, w2, b2)
    assert jnp.allclose(y, y_ref, atol=1e-5, rtol=1e-5), \
        float(jnp.max(jnp.abs(y - y_ref)))

    # 2) Default tiling: HW fits the budget -> single full-extent tile, grid_k=1.
    y_d = jax.block_until_ready(filter_layer(x, w1, b1, w2, b2))
    assert jnp.allclose(y_d, y_ref, atol=1e-5, rtol=1e-5), \
        float(jnp.max(jnp.abs(y_d - y_ref)))

    # 3) Non-multiple-of-128 spatial extent with forced tiling: HW=144 is padded
    #    to 256 with zeros (exact, since the mean is folded into w1).
    x2 = jax.random.normal(kx2, (B, in_planes, 12, 12), dtype=jnp.float32)
    y2 = jax.block_until_ready(filter_layer(x2, w1, b1, w2, b2, hw_tile=128))
    y2_ref = _reference_f32(x2, w1, b1, w2, b2)
    assert y2.shape == (B, out_planes, 1, 1), y2.shape
    assert jnp.allclose(y2, y2_ref, atol=1e-5, rtol=1e-5), \
        float(jnp.max(jnp.abs(y2 - y2_ref)))

    print("KERNEL_OK")
</pallas_src>

<mosaic_0001>
module attributes {stable_mosaic.version = 11 : i64} {
  func.func @_filter_layer_kernel(%arg0: i32, %arg1: i32, %arg2: memref<2x32x128xf32, #tpu.memory_space<vmem>>, %arg3: memref<32x2xf32, #tpu.memory_space<vmem>>, %arg4: memref<1x2xf32, #tpu.memory_space<vmem>>, %arg5: memref<2x32xf32, #tpu.memory_space<vmem>>, %arg6: memref<1x32xf32, #tpu.memory_space<vmem>>, %arg7: memref<2x32xf32, #tpu.memory_space<vmem>>, %arg8: memref<2x32xf32, #tpu.memory_space<vmem>>) attributes {dimension_semantics = [#tpu.dimension_semantics<parallel>, #tpu.dimension_semantics<arbitrary>], iteration_bounds = array<i64: 1, 2>, scalar_prefetch = 0 : i64, scratch_operands = 1 : i64, tpu.core_type = #tpu.core_type<tc>, window_params = [{transform_indices = @transform_0, window_bounds = array<i64: 2, 32, 128>}, {pipeline_mode = #tpu.pipeline_mode<synchronous>, transform_indices = @transform_1, window_bounds = array<i64: 32, 2>}, {pipeline_mode = #tpu.pipeline_mode<synchronous>, transform_indices = @transform_2, window_bounds = array<i64: 1, 2>}, {pipeline_mode = #tpu.pipeline_mode<synchronous>, transform_indices = @transform_3, window_bounds = array<i64: 2, 32>}, {pipeline_mode = #tpu.pipeline_mode<synchronous>, transform_indices = @transform_4, window_bounds = array<i64: 1, 32>}, {transform_indices = @transform_5, window_bounds = array<i64: 2, 32>}]} {
    %c0_i32 = arith.constant 0 : i32
    %0 = arith.cmpi eq, %arg1, %c0_i32 : i32
    %1 = arith.extui %0 : i1 to i32
    %c0_i32_0 = arith.constant 0 : i32
    %2 = arith.cmpi ne, %1, %c0_i32_0 : i32
    scf.if %2 {
      %cst_8 = arith.constant 0.000000e+00 : f32
      %11 = vector.broadcast %cst_8 : f32 to vector<2x32xf32>
      %c0_9 = arith.constant 0 : index
      %c0_10 = arith.constant 0 : index
      %12 = vector.load %arg8[%c0_9, %c0_10] : memref<2x32xf32, #tpu.memory_space<vmem>>, vector<2x32xf32>
      tpu.vector_store %arg8[%c0_9, %c0_10], %11 {strides = array<i32>} : memref<2x32xf32, #tpu.memory_space<vmem>>, vector<2x32xf32>,
    } else {
    }
    %c0 = arith.constant 0 : index
    %c0_1 = arith.constant 0 : index
    %3 = vector.load %arg8[%c0, %c0_1] : memref<2x32xf32, #tpu.memory_space<vmem>>, vector<2x32xf32>
    %c0_2 = arith.constant 0 : index
    %c0_3 = arith.constant 0 : index
    %c0_4 = arith.constant 0 : index
    %4 = vector.load %arg2[%c0_2, %c0_3, %c0_4] : memref<2x32x128xf32, #tpu.memory_space<vmem>>, vector<2x32x128xf32>
    %cst = arith.constant dense<0.000000e+00> : vector<2x32xf32>
    %5 = vector.multi_reduction <add>, %4, %cst [2] : vector<2x32x128xf32> to vector<2x32xf32>
    %6 = arith.addf %3, %5 : vector<2x32xf32>
    %c0_5 = arith.constant 0 : index
    %c0_6 = arith.constant 0 : index
    %7 = vector.load %arg8[%c0_5, %c0_6] : memref<2x32xf32, #tpu.memory_space<vmem>>, vector<2x32xf32>
    tpu.vector_store %arg8[%c0_5, %c0_6], %6 {strides = array<i32>} : memref<2x32xf32, #tpu.memory_space<vmem>>, vector<2x32xf32>,
    %c1_i32 = arith.constant 1 : i32
    %8 = arith.cmpi eq, %arg1, %c1_i32 : i32
    %9 = arith.extui %8 : i1 to i32
    %c0_i32_7 = arith.constant 0 : i32
    %10 = arith.cmpi ne, %9, %c0_i32_7 : i32
    scf.if %10 {
      %c0_8 = arith.constant 0 : index
      %c0_9 = arith.constant 0 : index
      %11 = vector.load %arg8[%c0_8, %c0_9] : memref<2x32xf32, #tpu.memory_space<vmem>>, vector<2x32xf32>
      %c0_10 = arith.constant 0 : index
      %c0_11 = arith.constant 0 : index
      %12 = vector.load %arg3[%c0_10, %c0_11] : memref<32x2xf32, #tpu.memory_space<vmem>>, vector<32x2xf32>
      %cst_12 = arith.constant dense<0.000000e+00> : vector<2x2xf32>
      %13 = tpu.matmul %11, %12, %cst_12 {dimension_numbers = #tpu.dot_dimension_numbers<[1], [0], [0], [1], [0, 0, 1, 1], [], []>} : vector<2x32xf32>, vector<32x2xf32>, vector<2x2xf32> -> vector<2x2xf32>
      %c0_13 = arith.constant 0 : index
      %c0_14 = arith.constant 0 : index
      %14 = vector.load %arg4[%c0_13, %c0_14] : memref<1x2xf32, #tpu.memory_space<vmem>>, vector<1x2xf32>
      %15 = vector.broadcast %14 : vector<1x2xf32> to vector<2x2xf32>
      %16 = arith.addf %13, %15 : vector<2x2xf32>
      %cst_15 = arith.constant 0.000000e+00 : f32
      %17 = vector.broadcast %cst_15 : f32 to vector<2x2xf32>
      %18 = arith.maximumf %16, %17 : vector<2x2xf32>
      %c0_16 = arith.constant 0 : index
      %c0_17 = arith.constant 0 : index
      %19 = vector.load %arg5[%c0_16, %c0_17] : memref<2x32xf32, #tpu.memory_space<vmem>>, vector<2x32xf32>
      %cst_18 = arith.constant dense<0.000000e+00> : vector<2x32xf32>
      %20 = tpu.matmul %18, %19, %cst_18 {dimension_numbers = #tpu.dot_dimension_numbers<[1], [0], [0], [1], [0, 0, 1, 1], [], []>} : vector<2x2xf32>, vector<2x32xf32>, vector<2x32xf32> -> vector<2x32xf32>
      %c0_19 = arith.constant 0 : index
      %c0_20 = arith.constant 0 : index
      %21 = vector.load %arg6[%c0_19, %c0_20] : memref<1x32xf32, #tpu.memory_space<vmem>>, vector<1x32xf32>
      %22 = vector.broadcast %21 : vector<1x32xf32> to vector<2x32xf32>
      %23 = arith.addf %20, %22 : vector<2x32xf32>
      %24 = arith.negf %23 : vector<2x32xf32>
      %25 = math.exp %24 : vector<2x32xf32>
      %cst_21 = arith.constant 1.000000e+00 : f32
      %26 = vector.broadcast %cst_21 : f32 to vector<2x32xf32>
      %27 = arith.addf %26, %25 : vector<2x32xf32>
      %28 = arith.divf %26, %27 : vector<2x32xf32>
      %c0_22 = arith.constant 0 : index
      %c0_23 = arith.constant 0 : index
      %29 = vector.load %arg7[%c0_22, %c0_23] : memref<2x32xf32, #tpu.memory_space<vmem>>, vector<2x32xf32>
      tpu.vector_store %arg7[%c0_22, %c0_23], %28 {strides = array<i32>} : memref<2x32xf32, #tpu.memory_space<vmem>>, vector<2x32xf32>,
    } else {
    }
    return
  }
  func.func @transform_0(%arg0: i32, %arg1: i32) -> (i32, i32, i32) {
    %c0_i32 = arith.constant 0 : i32
    %c0_i32_0 = arith.constant 0 : i32
    return %arg0, %c0_i32, %arg1 : i32, i32, i32
  }
  func.func @transform_1(%arg0: i32, %arg1: i32) -> (i32, i32) {
    %c0_i32 = arith.constant 0 : i32
    %c0_i32_0 = arith.constant 0 : i32
    %c0_i32_1 = arith.constant 0 : i32
    return %c0_i32, %c0_i32_0 : i32, i32
  }
  func.func @transform_2(%arg0: i32, %arg1: i32) -> (i32, i32) {
    %c0_i32 = arith.constant 0 : i32
    %c0_i32_0 = arith.constant 0 : i32
    %c0_i32_1 = arith.constant 0 : i32
    return %c0_i32, %c0_i32_0 : i32, i32
  }
  func.func @transform_3(%arg0: i32, %arg1: i32) -> (i32, i32) {
    %c0_i32 = arith.constant 0 : i32
    %c0_i32_0 = arith.constant 0 : i32
    %c0_i32_1 = arith.constant 0 : i32
    return %c0_i32, %c0_i32_0 : i32, i32
  }
  func.func @transform_4(%arg0: i32, %arg1: i32) -> (i32, i32) {
    %c0_i32 = arith.constant 0 : i32
    %c0_i32_0 = arith.constant 0 : i32
    %c0_i32_1 = arith.constant 0 : i32
    return %c0_i32, %c0_i32_0 : i32, i32
  }
  func.func @transform_5(%arg0: i32, %arg1: i32) -> (i32, i32) {
    %c0_i32 = arith.constant 0 : i32
    %c0_i32_0 = arith.constant 0 : i32
    return %arg0, %c0_i32 : i32, i32
  }
}

</mosaic_0001>

<bundles_post_ra>
// kernel: tpu_custom_call.1
= control target key start
LH: loop header
LB: loop body
LE: loop exit
PB: predicated region body
PF: predicated region fallthrough
CT: control target
= control target key end

     0   :  { %10 = vsyncpa [#allocation4], 0  ;;  %s840_s0 = inlined_call_operand.hbm [shape: f32[2,32,256], index: 0, kind: input, shape index: {}]   ;;  %s841_s1 = inlined_call_operand.vmem [shape: f32[32,2], index: 1, kind: input, shape index: {}]   ;;  %s842_s2 = inlined_call_operand.vmem [shape: f32[1,2], index: 2, kind: input, shape index: {}]   ;;  %s843_s3 = inlined_call_operand.vmem [shape: f32[2,32], index: 3, kind: input, shape index: {}]   ;;  %s844_s4 = inlined_call_operand.vmem [shape: f32[1,32], index: 4, kind: input, shape index: {}]   ;;  %s845_s5 = inlined_call_operand.hbm [shape: f32[2,32], index: 5, kind: output, shape index: {}]  }
   0x1   :  { %12 = vsyncpa [#allocation4 + $0x1], 0 }
   0x2   :  { %13 = vsyncpa [#allocation5], 0  ;;  %s725_s18 = smov 0   ;;  %s727_s19 = smov 0  }
   0x3   :  { %s729_s20 = smov 0   ;;  %s731_s21 = smov 0  }
   0x4   :  { %s733_s22 = smov 0   ;;  %s735_s23 = smov 0  }
   0x5 LB: > { %s487_s24 = sadd.s32 4294967295, %s688_s23   ;;  %s28_s25 = sadd.s32 1, %s684_s22  ;;  %s688_s23 = sphi %s735_s23, %s19_s23   ;;  %s684_s22 = sphi %s733_s22, %s852_s22   ;;  %s680_s21 = sphi %s731_s21, %s851_s21   ;;  %s676_s20 = sphi %s729_s20, %s850_s20   ;;  %s672_s19 = sphi %s727_s19, %s849_s19   ;;  %s668_s18 = sphi %s725_s18, %s848_s18  }
   0x6   : > { %p29_p0 = scmp.ge.s32.totalorder %s28_s25, 2  ;;  %s40_s26 = sadd.s32 1, %s676_s20 }
   0x7   : > { %p47_p1 = scmp.ne.s32.totalorder %s676_s20, %s672_s19  ;;  %p48_p2 = scmp.eq.s32.totalorder %s688_s23, 0 }
   0x8   : > { %s854_s25 = smov (%p29_p0, %s28_s25), 0  ;;  %p53_p4 = scmp.ne.s32.totalorder %s672_s19, %s668_s18 }
   0x9   : > { %p761_p3 = por %p48_p2, %p47_p1  ;;  %s36_s28 = ssub.s32 %s684_s22, %s854_s25 }
   0xa   : > { %p54_p5 = scmp.eq.s32.totalorder %s487_s24, 0  ;;  %p38_p6 = scmp.eq.s32.totalorder %s36_s28, 0 }
   0xb   : > { %p514_p8 = scmp.lt.s32.totalorder %s688_s23, 2  ;;  %s199_s6 = sand.u32 1, %s676_s20  }
   0xc   : > { %p770_p7 = por %p54_p5, %p53_p4  ;;  %s491_s7 = sshll.u32 %s684_s22, 3 }
   0xd   : > { %s776_s30 = scalar_select %p38_p6, %s676_s20, %s40_s26  }
   0xe   : > { %s490_s8 = sshll.u32 %s199_s6, 6  ;;  %s210_s11 = scalar_lea.hbm %s840_s0, %s491_s7 }
   0xf   : > { %s211_s12 = sshll.u32 %s210_s11, 4  ;;  %s203_s13 = scalar_lea.vmem [#allocation3], %s490_s8  ;;  %s212_s12 = int_to_ptr.hbm [resolvable:$true] %s211_s12 }
  0x10   : > { %s213_s14 = sshll.u32 %s203_s13, 4  ;;  %p511_p9 = pnand %p514_p8, %p761_p3  ;;  %s214_s14 = int_to_ptr.vmem [resolvable:$true] %s213_s14 }
  0x11   : > { %p492_p10 = scmp.ge.s32.totalorder %s688_s23, 1  ;;  %s200_s15 = scalar_lea.sflag [#allocation4], %s199_s6 }
  0x12   : > { %s690_s16 = smov 256   ;;  %s691_s17 = smov 128  }
  0x13   : > { %s692_s18 = smov 8   ;;  %p221_p11 = scmp.lt.s32.totalorder %s688_s23, 3 }
  0x14   : > { %513 = dma.hbm_to_vmem [thread:$0]  (!%p511_p9), %s212_s12, 1024, %s214_s14, %s200_s15, %s690_s16, %s691_s17, %s692_s18  }
  0x15   : > { %p222_p12 = pnand %p492_p10, %p221_p11 }
  0x16   : > { %s227_s26 = sand.u32 (!%p222_p12), 1, %s672_s19  }
  0x17   : > { %225 = sbr.rel (%p222_p12) target bundleno = 480 (0x1e0), region = 40  ;;  %s493_s28 = sshll.u32 (!%p222_p12), %s227_s26, 6 }
  0x18   : > { %s228_s7 = scalar_lea.sflag (!%p222_p12), [#allocation4], %s227_s26  ;;  %s231_s8 = scalar_lea.vmem (!%p222_p12), [#allocation3], %s493_s28 }
  0x1c   : > { %659 = dma.done.wait (%p770_p7), %s228_s7, 1024  }
  0x1d   : > { %661 = vsyncadd (%p770_p7), %s228_s7, 4294966272  ;;  %p494_p13 = scmp.ne.s32.totalorder %s680_s21, 0 }
  0x1f   : > { %258 = sbr.rel (%p494_p13) target bundleno = 38 (0x26), region = 48 }
  0x24   : > { %vm259_vm0 = vcmask 254976   ;;  %v693_v0 = vmov 0.0  }
  0x25   : > { %260 = vst.msk [vmem:[#allocation2] sm:$0x3] %vm259_vm0, %v693_v0 }
  0x26 PF: > { %v266_v1 = vld [vmem:[%s231_s8 + $0x20] sm:$0xff]  ;;  %v264_v3 = vld [vmem:[%s231_s8 + $0x10] sm:$0xff]  ;;  %v267_v4 = vld [vmem:[%s231_s8 + $0x28] sm:$0xff]  ;;  %v294_v11 = vlaneseq  ;;  %vm299_vm1 = vcmask 130112   ;;  %vm303_vm2 = vcmask 195712   ;;  %vm307_vm3 = vcmask 261312  }
  0x27   : > { %v262_v2 = vld [vmem:[%s231_s8] sm:$0xff]  ;;  %278 = vadd.xlane.f32.xlu1 %v266_v1  ;;  %274 = vadd.xlane.f32.xlu2 %v264_v3  ;;  %v263_v5 = vld [vmem:[%s231_s8 + $0x8] sm:$0xff]  ;;  %v268_v6 = vld [vmem:[%s231_s8 + $0x30] sm:$0xff]  ;;  %vm316_vm4 = vcmask 1041409   ;;  %vm320_vm5 = vcmask 254976   ;;  %p495_p0 = scmp.ne.s32.totalorder %s680_s21, 1 }
  0x28   : > { %270 = vadd.xlane.f32.xlu0 %v262_v2  ;;  %v269_v7 = vld [vmem:[%s231_s8 + $0x38] sm:$0xff]  ;;  %v295_v13 = vand.u32 127, %v294_v11 }
  0x29   : > { %v265_v8 = vld [vmem:[%s231_s8 + $0x18] sm:$0xff] }
  0x2a   : > { %v297_v14 = vadd.s32 4294967288, %v295_v13  ;;  %v301_v20 = vadd.s32 4294967280, %v295_v13  ;;  %v305_v23 = vadd.s32 4294967272, %v295_v13 }
  0x2c   : > { %v261_v34 = vld [vmem:[#allocation2] sm:$0x3] }
  0x2f   : > { %280 = vadd.xlane.f32.xlu1 %v267_v4  ;;  %282 = vadd.xlane.f32.xlu2 %v268_v6 }
  0x30   : > { %272 = vadd.xlane.f32.xlu0 %v263_v5 }
  0x37   : > { %284 = vadd.xlane.f32.xlu1 %v269_v7 }
  0x38   : > { %276 = vadd.xlane.f32.xlu0 %v265_v8 }
  0x9a   : > { %v279_v9 = vpop.xlane.xlu1 %278  ;;  %v275_v12 = vpop.xlane.xlu2 %274 }
  0x9b   : > { %v271_v10 = vpop.xlane.xlu0 %270  ;;  %v309_v21 = vperm.slane %v279_v9, %v295_v13  ;;  %v302_v27 = vperm.slane %v275_v12, %v301_v20 }
  0x9c   : > { %v296_v22 = vperm.slane %v271_v10, %v295_v13 }
  0xa2   : > { %v281_v15 = vpop.xlane.xlu1 %280  ;;  %v283_v19 = vpop.xlane.xlu2 %282 }
  0xa3   : > { %v273_v16 = vpop.xlane.xlu0 %272  ;;  %v310_v17 = vperm.slane %v281_v15, %v297_v14  ;;  %v312_v24 = vperm.slane %v283_v19, %v301_v20 }
  0xa4   : > { %v298_v18 = vperm.slane %v273_v16, %v297_v14 }
  0xa5   : > { %v311_v25 = vsel %vm299_vm1, %v310_v17, %v309_v21 }
  0xa6   : > { %v300_v26 = vsel %vm299_vm1, %v298_v18, %v296_v22  ;;  %v313_v32 = vsel %vm303_vm2, %v312_v24, %v311_v25 }
  0xa7   : > { %v304_v33 = vsel %vm303_vm2, %v302_v27, %v300_v26 }
  0xaa   : > { %v285_v28 = vpop.xlane.xlu1 %284 }
  0xab   : > { %v277_v29 = vpop.xlane.xlu0 %276  ;;  %v314_v30 = vperm.slane %v285_v28, %v305_v23 }
  0xac   : > { %v306_v31 = vperm.slane %v277_v29, %v305_v23 }
  0xad   : > { %v315_v35 = vsel %vm307_vm3, %v314_v30, %v313_v32 }
  0xae   : > { %v308_v36 = vsel %vm307_vm3, %v306_v31, %v304_v33  ;;  %325 = sbr.rel (%p495_p0) target bundleno = 474 (0x1da), region = 52 }
  0xaf   : > { %v317_v37 = vsel %vm316_vm4, %v315_v35, %v308_v36 }
  0xb0   : > { %v319_v38 = vadd.f32 %v317_v37, %v261_v34 }
  0xb2   : > { %321 = vst.msk [vmem:[#allocation2] sm:$0x3] %vm320_vm5, %v319_v38 }
  0xb3   : > { %v330_v39 = vld [vmem:[%s841_s1 + $0x18] sm:$0xff]  ;;  %v329_v40 = vld [vmem:[%s841_s1 + $0x10] sm:$0xff]  ;;  %v328_v41 = vld [vmem:[%s841_s1 + $0x8] sm:$0xff]  ;;  %vm335_vm6 = vcmask 261120   ;;  %vm369_vm7 = vcmask 1041408   ;;  %vm365_vm8 = vcmask 15360  }
  0xb4   : > { %351 = vmatpush.msra.mxu0 %v330_v39  ;;  %v327_v42 = vld [vmem:[%s841_s1] sm:$0xff] }
  0xb5   : > { %v360_v44 = vld [vmem:[%s843_s3] sm:$0x3] }
  0xb6   : > { %352 = vmatpush.msra.mxu0 %v329_v40  ;;  %497 = vmatpush.msk.msra.mxu1 %vm369_vm7, %v360_v44  ;;  %v570_v45 = vld [vmem:[%s842_s2] ss:$0 sm:$0xff] }
  0xb7   : > { %v571_v49 = vld [vmem:[%s844_s4] ss:$0 sm:$0xff] }
  0xb8   : > { %353 = vmatpush.msra.mxu0 %v328_v41 }
  0xb9   : > { %v326_v43 = vld [vmem:[#allocation2] sm:$0x3] }
  0xba   : > { %354 = vmatpush.msra.mxu0 %v327_v42 }
  0xbb   : > { %496 = vmatmul.msk.f32.vlgmr.msra.gmra.mxu0 %vm335_vm6, %v326_v43 }
 0x138   : > { %v356_v46 = vpop.f32.mrf.mxu0 }
 0x139   : > { %v357_v47 = vadd.f32 %v570_v45, %v356_v46 }
 0x13b   : > { %v359_v48 = vmax.f32 %v357_v47, 0.0 }
 0x13d   : > { %498 = vmatmul.msk.f32.vlgmr.msra.gmra.mxu1 %vm365_vm8, %v359_v48 }
 0x1ba   : > { %v390_v50 = vpop.f32.mrf.mxu1 }
 0x1bb   : > { %v391_v51 = vadd.f32 %v571_v49, %v390_v50 }
 0x1bd   : > { %v499_v52 = vmul.f32 -1.442695, %v391_v51 }
 0x1bf   : > { %572 = vpow2.f32 %v499_v52 }
 0x1c5   : > { %v573_v53 = vpop.eup %572 }
 0x1c6   : > { %v396_v54 = vadd.f32 1.0, %v573_v53 }
 0x1c8   : > { %574 = vrcp.f32 %v396_v54  ;;  %v408_v58 = vand.u32 2147483648, %v396_v54  ;;  %v406_v60 = vand.u32 2147483647, %v396_v54  ;;  %vm402_vm10 = vweird.f32 %v396_v54 }
 0x1ca   : > { %v409_v62 = vor.u32 1.1754944e-38, %v408_v58  ;;  %vm407_vm12 = vcmp.eq.f32.partialorder %v406_v60, 8.507059e+37 }
 0x1ce   : > { %v575_v55 = vpop.eup %574 }
 0x1cf   : > { %v398_v56 = vmul.f32 %v575_v55, %v396_v54  ;;  %vm403_vm9 = vweird.f32 %v575_v55 }
 0x1d0   : > { %vm404_vm11 = vmor %vm402_vm10, %vm403_vm9 }
 0x1d1   : > { %v399_v57 = vsub.f32 1.0, %v398_v56 }
 0x1d3   : > { %v400_v59 = vmul.f32 %v575_v55, %v399_v57 }
 0x1d5   : > { %v401_v61 = vadd.f32 %v575_v55, %v400_v59 }
 0x1d7   : > { %v405_v63 = vsel %vm404_vm11, %v575_v55, %v401_v61 }
 0x1d8   : > { %v410_v0 = vsel %vm407_vm12, %v409_v62, %v405_v63 }
 0x1d9   : > { %412 = vst.msk [vmem:[#allocation6] sm:$0x3] %vm320_vm5, %v410_v0 }
 0x1da PF: > { %p515_p1 = scmp.eq.s32.totalorder %s487_s24, 1  ;;  %s423_s7 = sshll.u32 %s845_s5, 4  ;;  %s424_s7 = int_to_ptr.hbm [resolvable:$true] %s423_s7 }
 0x1db   : > { %s694_s8 = smov [#allocation6]  }
 0x1dc   : > { %s421_s27 = sshll.u32 %s694_s8, 4  ;;  %s422_s27 = int_to_ptr.vmem [resolvable:$true] %s421_s27 }
 0x1dd   : > { %507 = dma.vmem_to_hbm [thread:$0]  (%p515_p1), %s422_s27, 32, %s424_s7, [#allocation5]  }
 0x1de   : > { %663 = dma.done.wait (%p515_p1), [#allocation5], 32  }
 0x1df   : > { %665 = vsyncadd (%p515_p1), [#allocation5], 4294967264 }
 0x1e0 PF: > { %s19_s23 = sadd.s32 1, %s688_s23   ;;  %s848_s18 = smov %s672_s19 }
 0x1e1   : > { %p16_p2 = scmp.ge.s32.totalorder %s19_s23, 4   ;;  %s849_s19 = smov %s676_s20 }
 0x1e2   : > { %s850_s20 = smov %s776_s30  ;;  %s851_s21 = smov %s684_s22 }
 0x1e3   : > { %s852_s22 = smov %s854_s25  ;;  %18 = sbr.rel (!%p16_p2) target bundleno = 5 (0x5), region = 86 }
 0x1e8   :  { %437 = vsyncpa [#allocation4], 1 }
 0x1e9   :  { %439 = vsyncpa [#allocation4 + $0x1], 1 }
 0x1ea   :  { %440 = vsyncpa [#allocation5], 1 }
 0x1eb   :  { %442 = vsyncpa [#allocation5 + $0x1], 1 }

</bundles_post_ra>
